<compile_context>
chip_gen: v5e
topology: v5e:2x2
jax: 0.10.0
libtpu: 0.0.40
codegen_flags: <defaults>
</compile_context>

<pallas_src>
import functools

import jax
import jax.numpy as jnp
from jax.experimental import pallas as pl
from jax.experimental.pallas import tpu as pltpu

H1, H2, H3 = 256, 128, 64
LANE = 128
# 16-row alignment satisfies both the f32 (8,128) and bf16 (16,128) native
# tilings, so the same batch tile is legal for the f32 x block and the bf16
# output block.
ROW = 16


def _cdiv(a, b):
    return -(-a // b)


def _round_up(x, m):
    return _cdiv(x, m) * m


def _mlp_logsoftmax_kernel(x_ref, w1_ref, b1_ref, w2_ref, b2_ref,
                           w3_ref, b3_ref, w4_ref, b4_ref, o_ref):
    """fc1->ReLU->fc2->ReLU->fc3->ReLU->fc4->log_softmax fused per batch tile."""
    # x arrives f32 straight from HBM; cast to bf16 feeding the MXU (the pack
    # hides under matmul VPU slack — cheaper than a separate wrapper pass).
    x = x_ref[...].astype(jnp.bfloat16)

    h = jnp.dot(x, w1_ref[...], preferred_element_type=jnp.float32) + b1_ref[...]
    h = jnp.maximum(h, 0.0)
    # TODO(synk): dropout(p=0.3) is identity in eval mode; no PRNG mask applied
    # (a training-mode kernel would need pltpu.prng_seed/prng_random_bits).

    h = jnp.dot(h.astype(jnp.bfloat16), w2_ref[...],
                preferred_element_type=jnp.float32) + b2_ref[...]
    h = jnp.maximum(h, 0.0)

    h = jnp.dot(h.astype(jnp.bfloat16), w3_ref[...],
                preferred_element_type=jnp.float32) + b3_ref[...]
    h = jnp.maximum(h, 0.0)

    logits = jnp.dot(h.astype(jnp.bfloat16), w4_ref[...],
                     preferred_element_type=jnp.float32) + b4_ref[...]

    # Numerically stable log-softmax over the padded, lane-dense feature axis.
    # Pad columns have zero weights and bias = -1e30, so exp() underflows to
    # exactly 0 and the real-class results are unchanged; pad outputs stay
    # finite (and representable in bf16) and are sliced off by the wrapper.
    m = jnp.max(logits, axis=-1, keepdims=True)
    shifted = logits - m
    lse = jnp.log(jnp.sum(jnp.exp(shifted), axis=-1, keepdims=True))
    o_ref[...] = (shifted - lse).astype(o_ref.dtype)


def prepare_params(params):
    """One-time prep: pad fc4 to a 128-lane output, cast weights to bf16.

    Biases stay f32 (added after the f32 accumulation).
    Returns (prepared_params, output_size).
    """
    out_size = params["w4"].shape[1]
    pad = (-out_size) % LANE
    w4 = jnp.pad(params["w4"], ((0, 0), (0, pad)))
    b4 = jnp.pad(params["b4"], ((0, 0), (0, pad)), constant_values=-1e30)
    prep = {
        "w1": params["w1"].astype(jnp.bfloat16),
        "b1": params["b1"].astype(jnp.float32),
        "w2": params["w2"].astype(jnp.bfloat16),
        "b2": params["b2"].astype(jnp.float32),
        "w3": params["w3"].astype(jnp.bfloat16),
        "b3": params["b3"].astype(jnp.float32),
        "w4": w4.astype(jnp.bfloat16),
        "b4": b4.astype(jnp.float32),
    }
    return prep, out_size


@functools.partial(jax.jit,
                   static_argnames=("output_size", "batch_tile", "out_dtype"))
def neural_network_forward(x, prep, output_size, batch_tile=512,
                           out_dtype=jnp.bfloat16):
    """x: (B, input_size) float32. prep: output of prepare_params."""
    B, input_size = x.shape
    padded_out = prep["w4"].shape[1]

    # Padding-aware tile selection:
    #  * cap the tile so the grid has >= 2 steps whenever the batch allows it
    #    (keeps both v7x TensorCores busy under dimension_semantics=parallel;
    #    on single-core v5e/v6e the extra step costs ~0.35 us),
    #  * then size the tile to the actual work so batch padding is < ROW rows
    #    per grid step (instead of up to batch_tile-1 rows of wasted MXU work,
    #    exp()s and HBM writes).
    tile_cap = max(ROW, min(batch_tile, _round_up(_cdiv(B, 2), ROW)))
    grid_n = max(1, _cdiv(B, tile_cap))
    tile = _round_up(_cdiv(B, grid_n), ROW)
    b_pad = grid_n * tile

    if b_pad != B:
        x = jnp.pad(x, ((0, b_pad - B), (0, 0)))

    def x_map(i):
        return (i, 0)

    def full_map(i):
        # Same block index every grid step -> Mosaic keeps the weights/biases
        # resident in VMEM across the grid instead of re-DMA-ing them.
        return (0, 0)

    param_names = ("w1", "b1", "w2", "b2", "w3", "b3", "w4", "b4")
    weight_specs = [pl.BlockSpec(prep[n].shape, full_map) for n in param_names]
    weight_bytes = sum(int(prep[n].size) * prep[n].dtype.itemsize
                       for n in param_names)

    out_itemsize = jnp.dtype(out_dtype).itemsize
    flops = 2 * b_pad * (input_size * H1 + H1 * H2 + H2 * H3 + H3 * padded_out)
    bytes_accessed = (b_pad * input_size * 4 + weight_bytes
                      + b_pad * padded_out * out_itemsize)

    # Tight VMEM budget: double-buffered x/out tiles + resident weights +
    # headroom for the f32 intermediates. Stays far below v7x's 64 MiB
    # physical VMEM (the old blanket 48 MiB starved co-resident allocations).
    vmem_needed = (2 * tile * input_size * 4
                   + 2 * tile * padded_out * out_itemsize
                   + weight_bytes
                   + tile * (H1 + H2 + H3 + padded_out) * 4)
    vmem_limit = int(min(max(2 * vmem_needed, 16 * 1024 * 1024),
                         64 * 1024 * 1024))

    out = pl.pallas_call(
        _mlp_logsoftmax_kernel,
        out_shape=jax.ShapeDtypeStruct((b_pad, padded_out), out_dtype),
        grid_spec=pltpu.PrefetchScalarGridSpec(
            num_scalar_prefetch=0,
            grid=(grid_n,),
            in_specs=[pl.BlockSpec((tile, input_size), x_map)] + weight_specs,
            out_specs=pl.BlockSpec((tile, padded_out), x_map),
        ),
        compiler_params=pltpu.CompilerParams(
            dimension_semantics=("parallel",),
            vmem_limit_bytes=vmem_limit,
        ),
        cost_estimate=pl.CostEstimate(
            flops=flops,
            transcendentals=b_pad * (padded_out + 1),
            bytes_accessed=bytes_accessed),
    )(x, prep["w1"], prep["b1"], prep["w2"], prep["b2"],
      prep["w3"], prep["b3"], prep["w4"], prep["b4"])

    # Strip batch padding and the padded output lanes.
    # TODO(synk): for best throughput fuse the downstream consumer (argmax /
    # NLL loss) into the kernel epilogue instead of slicing the padded slab.
    return out[:B, :output_size]


def init_params(key, input_size, output_size):
    """Deterministic init mimicking PyTorch Linear: U(-1/sqrt(fan_in), +...)."""
    dims = [(input_size, H1), (H1, H2), (H2, H3), (H3, output_size)]
    params = {}
    for idx, (fan_in, fan_out) in enumerate(dims, start=1):
        key, kw, kb = jax.random.split(key, 3)
        bound = 1.0 / jnp.sqrt(float(fan_in))
        params[f"w{idx}"] = jax.random.uniform(
            kw, (fan_in, fan_out), jnp.float32, -bound, bound)
        params[f"b{idx}"] = jax.random.uniform(
            kb, (1, fan_out), jnp.float32, -bound, bound)
    return params


def reference_forward(x, params):
    """Pure-JAX reference with matching bf16 matmul inputs / f32 accumulation."""
    def dot(a, w):
        return jnp.dot(a.astype(jnp.bfloat16), w.astype(jnp.bfloat16),
                       preferred_element_type=jnp.float32)

    h = jnp.maximum(dot(x, params["w1"]) + params["b1"], 0.0)
    h = jnp.maximum(dot(h, params["w2"]) + params["b2"], 0.0)
    h = jnp.maximum(dot(h, params["w3"]) + params["b3"], 0.0)
    logits = dot(h, params["w4"]) + params["b4"]
    return jax.nn.log_softmax(logits, axis=1)


if __name__ == "__main__":
    key = jax.random.PRNGKey(0)
    k_param, k_x = jax.random.split(key)

    batch = 12          # exercises batch padding (not a multiple of 16)
    input_size = 32     # stand-in for metadata['input_size']
    output_size = 10    # stand-in for metadata['output_size']

    params = init_params(k_param, input_size, output_size)
    x = jax.random.normal(k_x, (batch, input_size), jnp.float32)

    prep, out_size = prepare_params(params)
    out = neural_network_forward(x, prep, output_size=out_size)
    out = jax.block_until_ready(out)

    ref = reference_forward(x, params)
    assert out.shape == (batch, output_size)
    # bf16 output store -> slightly looser tolerance than a pure-f32 epilogue.
    assert jnp.allclose(out.astype(jnp.float32), ref, atol=2e-2, rtol=2e-2), \
        "mismatch vs reference"

    print("KERNEL_OK")
</pallas_src>

<mosaic_0001>
module attributes {stable_mosaic.version = 11 : i64} {
  func.func @_mlp_logsoftmax_kernel(%arg0: i32, %arg1: memref<16x32xf32, #tpu.memory_space<vmem>>, %arg2: memref<32x256xbf16, #tpu.memory_space<vmem>>, %arg3: memref<1x256xf32, #tpu.memory_space<vmem>>, %arg4: memref<256x128xbf16, #tpu.memory_space<vmem>>, %arg5: memref<1x128xf32, #tpu.memory_space<vmem>>, %arg6: memref<128x64xbf16, #tpu.memory_space<vmem>>, %arg7: memref<1x64xf32, #tpu.memory_space<vmem>>, %arg8: memref<64x128xbf16, #tpu.memory_space<vmem>>, %arg9: memref<1x128xf32, #tpu.memory_space<vmem>>, %arg10: memref<16x128xbf16, #tpu.memory_space<vmem>>) attributes {dimension_semantics = [#tpu.dimension_semantics<parallel>], iteration_bounds = array<i64: 1>, scalar_prefetch = 0 : i64, scratch_operands = 0 : i64, tpu.core_type = #tpu.core_type<tc>, window_params = [{transform_indices = @transform_0, window_bounds = array<i64: 16, 32>}, {pipeline_mode = #tpu.pipeline_mode<synchronous>, transform_indices = @transform_1, window_bounds = array<i64: 32, 256>}, {pipeline_mode = #tpu.pipeline_mode<synchronous>, transform_indices = @transform_2, window_bounds = array<i64: 1, 256>}, {pipeline_mode = #tpu.pipeline_mode<synchronous>, transform_indices = @transform_3, window_bounds = array<i64: 256, 128>}, {pipeline_mode = #tpu.pipeline_mode<synchronous>, transform_indices = @transform_4, window_bounds = array<i64: 1, 128>}, {pipeline_mode = #tpu.pipeline_mode<synchronous>, transform_indices = @transform_5, window_bounds = array<i64: 128, 64>}, {pipeline_mode = #tpu.pipeline_mode<synchronous>, transform_indices = @transform_6, window_bounds = array<i64: 1, 64>}, {pipeline_mode = #tpu.pipeline_mode<synchronous>, transform_indices = @transform_7, window_bounds = array<i64: 64, 128>}, {pipeline_mode = #tpu.pipeline_mode<synchronous>, transform_indices = @transform_8, window_bounds = array<i64: 1, 128>}, {transform_indices = @transform_9, window_bounds = array<i64: 16, 128>}]} {
    %c0 = arith.constant 0 : index
    %c0_0 = arith.constant 0 : index
    %0 = vector.load %arg1[%c0, %c0_0] : memref<16x32xf32, #tpu.memory_space<vmem>>, vector<16x32xf32>
    %1 = arith.truncf %0 : vector<16x32xf32> to vector<16x32xbf16>
    %c0_1 = arith.constant 0 : index
    %c0_2 = arith.constant 0 : index
    %2 = vector.load %arg2[%c0_1, %c0_2] : memref<32x256xbf16, #tpu.memory_space<vmem>>, vector<32x256xbf16>
    %cst = arith.constant dense<0.000000e+00> : vector<16x256xf32>
    %3 = tpu.matmul %1, %2, %cst {dimension_numbers = #tpu.dot_dimension_numbers<[1], [0], [0], [1], [0, 0, 1, 1], [], []>} : vector<16x32xbf16>, vector<32x256xbf16>, vector<16x256xf32> -> vector<16x256xf32>
    %c0_3 = arith.constant 0 : index
    %c0_4 = arith.constant 0 : index
    %4 = vector.load %arg3[%c0_3, %c0_4] : memref<1x256xf32, #tpu.memory_space<vmem>>, vector<1x256xf32>
    %5 = vector.broadcast %4 : vector<1x256xf32> to vector<16x256xf32>
    %6 = arith.addf %3, %5 : vector<16x256xf32>
    %cst_5 = arith.constant 0.000000e+00 : f32
    %7 = vector.broadcast %cst_5 : f32 to vector<16x256xf32>
    %8 = arith.maximumf %6, %7 : vector<16x256xf32>
    %9 = arith.truncf %8 : vector<16x256xf32> to vector<16x256xbf16>
    %c0_6 = arith.constant 0 : index
    %c0_7 = arith.constant 0 : index
    %10 = vector.load %arg4[%c0_6, %c0_7] : memref<256x128xbf16, #tpu.memory_space<vmem>>, vector<256x128xbf16>
    %cst_8 = arith.constant dense<0.000000e+00> : vector<16x128xf32>
    %11 = tpu.matmul %9, %10, %cst_8 {dimension_numbers = #tpu.dot_dimension_numbers<[1], [0], [0], [1], [0, 0, 1, 1], [], []>} : vector<16x256xbf16>, vector<256x128xbf16>, vector<16x128xf32> -> vector<16x128xf32>
    %c0_9 = arith.constant 0 : index
    %c0_10 = arith.constant 0 : index
    %12 = vector.load %arg5[%c0_9, %c0_10] : memref<1x128xf32, #tpu.memory_space<vmem>>, vector<1x128xf32>
    %13 = vector.broadcast %12 : vector<1x128xf32> to vector<16x128xf32>
    %14 = arith.addf %11, %13 : vector<16x128xf32>
    %cst_11 = arith.constant 0.000000e+00 : f32
    %15 = vector.broadcast %cst_11 : f32 to vector<16x128xf32>
    %16 = arith.maximumf %14, %15 : vector<16x128xf32>
    %17 = arith.truncf %16 : vector<16x128xf32> to vector<16x128xbf16>
    %c0_12 = arith.constant 0 : index
    %c0_13 = arith.constant 0 : index
    %18 = vector.load %arg6[%c0_12, %c0_13] : memref<128x64xbf16, #tpu.memory_space<vmem>>, vector<128x64xbf16>
    %cst_14 = arith.constant dense<0.000000e+00> : vector<16x64xf32>
    %19 = tpu.matmul %17, %18, %cst_14 {dimension_numbers = #tpu.dot_dimension_numbers<[1], [0], [0], [1], [0, 0, 1, 1], [], []>} : vector<16x128xbf16>, vector<128x64xbf16>, vector<16x64xf32> -> vector<16x64xf32>
    %c0_15 = arith.constant 0 : index
    %c0_16 = arith.constant 0 : index
    %20 = vector.load %arg7[%c0_15, %c0_16] : memref<1x64xf32, #tpu.memory_space<vmem>>, vector<1x64xf32>
    %21 = vector.broadcast %20 : vector<1x64xf32> to vector<16x64xf32>
    %22 = arith.addf %19, %21 : vector<16x64xf32>
    %cst_17 = arith.constant 0.000000e+00 : f32
    %23 = vector.broadcast %cst_17 : f32 to vector<16x64xf32>
    %24 = arith.maximumf %22, %23 : vector<16x64xf32>
    %25 = arith.truncf %24 : vector<16x64xf32> to vector<16x64xbf16>
    %c0_18 = arith.constant 0 : index
    %c0_19 = arith.constant 0 : index
    %26 = vector.load %arg8[%c0_18, %c0_19] : memref<64x128xbf16, #tpu.memory_space<vmem>>, vector<64x128xbf16>
    %cst_20 = arith.constant dense<0.000000e+00> : vector<16x128xf32>
    %27 = tpu.matmul %25, %26, %cst_20 {dimension_numbers = #tpu.dot_dimension_numbers<[1], [0], [0], [1], [0, 0, 1, 1], [], []>} : vector<16x64xbf16>, vector<64x128xbf16>, vector<16x128xf32> -> vector<16x128xf32>
    %c0_21 = arith.constant 0 : index
    %c0_22 = arith.constant 0 : index
    %28 = vector.load %arg9[%c0_21, %c0_22] : memref<1x128xf32, #tpu.memory_space<vmem>>, vector<1x128xf32>
    %29 = vector.broadcast %28 : vector<1x128xf32> to vector<16x128xf32>
    %30 = arith.addf %27, %29 : vector<16x128xf32>
    %cst_23 = arith.constant dense<0xFF800000> : vector<16xf32>
    %31 = vector.multi_reduction <maximumf>, %30, %cst_23 [1] : vector<16x128xf32> to vector<16xf32>
    %32 = vector.shape_cast %31 : vector<16xf32> to vector<16x1xf32>
    %33 = vector.broadcast %32 : vector<16x1xf32> to vector<16x128xf32>
    %34 = arith.subf %30, %33 : vector<16x128xf32>
    %35 = math.exp %34 : vector<16x128xf32>
    %cst_24 = arith.constant dense<0.000000e+00> : vector<16xf32>
    %36 = vector.multi_reduction <add>, %35, %cst_24 [1] : vector<16x128xf32> to vector<16xf32>
    %37 = vector.shape_cast %36 : vector<16xf32> to vector<16x1xf32>
    %38 = math.log %37 : vector<16x1xf32>
    %39 = vector.broadcast %38 : vector<16x1xf32> to vector<16x128xf32>
    %40 = arith.subf %34, %39 : vector<16x128xf32>
    %41 = arith.truncf %40 : vector<16x128xf32> to vector<16x128xbf16>
    %c0_25 = arith.constant 0 : index
    %c0_26 = arith.constant 0 : index
    %42 = vector.load %arg10[%c0_25, %c0_26] : memref<16x128xbf16, #tpu.memory_space<vmem>>, vector<16x128xbf16>
    tpu.vector_store %arg10[%c0_25, %c0_26], %41 {strides = array<i32>} : memref<16x128xbf16, #tpu.memory_space<vmem>>, vector<16x128xbf16>,
    return
  }
  func.func @transform_0(%arg0: i32) -> (i32, i32) {
    %c0_i32 = arith.constant 0 : i32
    %c0_i32_0 = arith.constant 0 : i32
    return %arg0, %c0_i32 : i32, i32
  }
  func.func @transform_1(%arg0: i32) -> (i32, i32) {
    %c0_i32 = arith.constant 0 : i32
    %c0_i32_0 = arith.constant 0 : i32
    %c0_i32_1 = arith.constant 0 : i32
    return %c0_i32, %c0_i32_0 : i32, i32
  }
  func.func @transform_2(%arg0: i32) -> (i32, i32) {
    %c0_i32 = arith.constant 0 : i32
    %c0_i32_0 = arith.constant 0 : i32
    %c0_i32_1 = arith.constant 0 : i32
    return %c0_i32, %c0_i32_0 : i32, i32
  }
  func.func @transform_3(%arg0: i32) -> (i32, i32) {
    %c0_i32 = arith.constant 0 : i32
    %c0_i32_0 = arith.constant 0 : i32
    %c0_i32_1 = arith.constant 0 : i32
    return %c0_i32, %c0_i32_0 : i32, i32
  }
  func.func @transform_4(%arg0: i32) -> (i32, i32) {
    %c0_i32 = arith.constant 0 : i32
    %c0_i32_0 = arith.constant 0 : i32
    %c0_i32_1 = arith.constant 0 : i32
    return %c0_i32, %c0_i32_0 : i32, i32
  }
  func.func @transform_5(%arg0: i32) -> (i32, i32) {
    %c0_i32 = arith.constant 0 : i32
    %c0_i32_0 = arith.constant 0 : i32
    %c0_i32_1 = arith.constant 0 : i32
    return %c0_i32, %c0_i32_0 : i32, i32
  }
  func.func @transform_6(%arg0: i32) -> (i32, i32) {
    %c0_i32 = arith.constant 0 : i32
    %c0_i32_0 = arith.constant 0 : i32
    %c0_i32_1 = arith.constant 0 : i32
    return %c0_i32, %c0_i32_0 : i32, i32
  }
  func.func @transform_7(%arg0: i32) -> (i32, i32) {
    %c0_i32 = arith.constant 0 : i32
    %c0_i32_0 = arith.constant 0 : i32
    %c0_i32_1 = arith.constant 0 : i32
    return %c0_i32, %c0_i32_0 : i32, i32
  }
  func.func @transform_8(%arg0: i32) -> (i32, i32) {
    %c0_i32 = arith.constant 0 : i32
    %c0_i32_0 = arith.constant 0 : i32
    %c0_i32_1 = arith.constant 0 : i32
    return %c0_i32, %c0_i32_0 : i32, i32
  }
  func.func @transform_9(%arg0: i32) -> (i32, i32) {
    %c0_i32 = arith.constant 0 : i32
    %c0_i32_0 = arith.constant 0 : i32
    return %arg0, %c0_i32 : i32, i32
  }
}

</mosaic_0001>

<bundles_post_ra>
// kernel: neural_network_forward.1
= control target key start
LH: loop header
LB: loop body
LE: loop exit
PB: predicated region body
PF: predicated region fallthrough
CT: control target
= control target key end

     0   :  { %14 = vsyncpa [#allocation3], 0  ;;  %s909_s0 = inlined_call_operand.vmem [shape: f32[16,32], index: 0, kind: input, shape index: {}]   ;;  %s910_s1 = inlined_call_operand.hbm [shape: bf16[32,256], index: 1, kind: input, shape index: {}]   ;;  %s911_s2 = inlined_call_operand.vmem [shape: f32[1,256], index: 2, kind: input, shape index: {}]   ;;  %s912_s3 = inlined_call_operand.vmem [shape: bf16[256,128], index: 3, kind: input, shape index: {}]   ;;  %s913_s4 = inlined_call_operand.vmem [shape: f32[1,128], index: 4, kind: input, shape index: {}]   ;;  %s914_s5 = inlined_call_operand.vmem [shape: bf16[128,64], index: 5, kind: input, shape index: {}]   ;;  %s915_s6 = inlined_call_operand.vmem [shape: f32[1,64], index: 6, kind: input, shape index: {}]   ;;  %s916_s7 = inlined_call_operand.hbm [shape: bf16[64,128], index: 7, kind: input, shape index: {}]   ;;  %s917_s8 = inlined_call_operand.vmem [shape: f32[1,128], index: 8, kind: input, shape index: {}]   ;;  %s918_s9 = inlined_call_operand.hbm [shape: bf16[16,128], index: 9, kind: output, shape index: {}]  }
   0x1   :  { %15 = vsyncpa [#allocation6], 0 }
   0x2   :  { %16 = vsyncpa [#allocation4], 0  ;;  %s23_s11 = sshll.u32 %s910_s1, 4  ;;  %s747_s12 = smov [#allocation2]   ;;  %s24_s11 = int_to_ptr.hbm [resolvable:$true] %s23_s11 }
   0x3   :  { %s25_s13 = sshll.u32 %s747_s12, 4  ;;  %s46_s16 = sshll.u32 %s916_s7, 4  ;;  %s26_s13 = int_to_ptr.vmem [resolvable:$true] %s25_s13  ;;  %s47_s16 = int_to_ptr.hbm [resolvable:$true] %s46_s16 }
   0x4   :  { %s748_s17 = smov 128   ;;  %s749_s18 = smov 8  }
   0x5   :  { %31 = dma.hbm_to_vmem [thread:$0]  %s24_s11, 512, %s26_s13, [#allocation3], %s748_s17, %s748_s17, %s749_s18  }
   0x6   :  { %s750_s19 = smov [#allocation5]   ;;  %s751_s21 = smov 64  }
   0x7   :  { %s48_s20 = sshll.u32 %s750_s19, 4  ;;  %s752_s22 = smov 4   ;;  %s49_s20 = int_to_ptr.vmem [resolvable:$true] %s48_s20 }
   0x8   :  { %54 = dma.hbm_to_vmem [thread:$0]  %s47_s16, 512, %s49_s20, [#allocation6], %s751_s21, %s751_s21, %s752_s22  }
   0x9   :  { %741 = dma.done.wait [#allocation3], 512  }
   0xa   :  { %742 = vsyncadd [#allocation3], 4294966784 }
   0xb   :  { %743 = dma.done.wait [#allocation6], 512  }
   0xc   :  { %744 = vsyncadd [#allocation6], 4294966784  ;;  %v493_v0 = vld [vmem:[#allocation2 + $0x10] sm:$0xf]  ;;  %v617_v1 = vld [vmem:[#allocation2 + $0x14] sm:$0xf0] }
   0xd   :  { %v616_v2 = vld [vmem:[#allocation2 + $0x14] sm:$0xf]  ;;  %v494_v3 = vor.u32 %v617_v1, %v493_v0  ;;  %v495_v4 = vld [vmem:[#allocation2 + $0x18] sm:$0xf0]  ;;  %v485_v5 = vld [vmem:[#allocation2] sm:$0xf] }
   0xe   :  { %v615_v6 = vld [vmem:[#allocation2 + $0x4] sm:$0xf0]  ;;  %v498_v7 = vor.u32 %v616_v2, %v495_v4  ;;  %v614_v8 = vld [vmem:[#allocation2 + $0x4] sm:$0xf]  ;;  %v487_v9 = vld [vmem:[#allocation2 + $0x8] sm:$0xf0] }
   0xf   :  { %v66_v10 = vld [vmem:[%s909_s0] sm:$0xff]  ;;  %109 = vmatpush.bf16.msra.mxu0 %v494_v3  ;;  %v486_v11 = vor.u32 %v615_v6, %v485_v5  ;;  %v67_v12 = vld [vmem:[%s909_s0 + $0x8] sm:$0xff]  ;;  %v625_v13 = vld [vmem:[%s912_s3 + $0x38] sm:$0xff]  ;;  %v490_v15 = vor.u32 %v614_v8, %v487_v9  ;;  %vm99_vm0 = vcmask 261120   ;;  %vm421_vm1 = vcmask 523264   ;;  %s469_s13 = sshll.u32 %s918_s9, 4  ;;  %s470_s13 = int_to_ptr.hbm [resolvable:$true] %s469_s13 }
  0x10   :  { %v633_v14 = vld [vmem:[%s912_s3 + $0x78] sm:$0xff]  ;;  %123 = vmatpush.bf16.msra.mxu1 %v498_v7  ;;  %269 = vmatpush.bf16.msra.mxu2 %v625_v13  ;;  %v624_v16 = vld [vmem:[%s912_s3 + $0x30] sm:$0xff]  ;;  %v68_v18 = vpack.c.bf16 %v67_v12, %v66_v10  ;;  %v623_v19 = vld [vmem:[%s912_s3 + $0x28] sm:$0xff] }
  0x11   :  { %283 = vmatpush.bf16.msra.mxu3 %v633_v14  ;;  %v632_v17 = vld [vmem:[%s912_s3 + $0x70] sm:$0xff]  ;;  %v631_v20 = vld [vmem:[%s912_s3 + $0x68] sm:$0xff]  ;;  %v622_v21 = vld [vmem:[%s912_s3 + $0x20] sm:$0xff] }
  0x12   :  { %v630_v22 = vld [vmem:[%s912_s3 + $0x60] sm:$0xff]  ;;  %v621_v23 = vld [vmem:[%s912_s3 + $0x18] sm:$0xff]  ;;  %v620_v25 = vld [vmem:[%s912_s3 + $0x10] sm:$0xff] }
  0x13   :  { %110 = vmatpush.bf16.msra.mxu0 %v486_v11  ;;  %v629_v24 = vld [vmem:[%s912_s3 + $0x58] sm:$0xff]  ;;  %v628_v26 = vld [vmem:[%s912_s3 + $0x50] sm:$0xff]  ;;  %v619_v27 = vld [vmem:[%s912_s3 + $0x8] sm:$0xff] }
  0x14   :  { %124 = vmatpush.bf16.msra.mxu1 %v490_v15  ;;  %270 = vmatpush.bf16.msra.mxu2 %v624_v16  ;;  %v627_v28 = vld [vmem:[%s912_s3 + $0x48] sm:$0xff]  ;;  %v618_v29 = vld [vmem:[%s912_s3] sm:$0xff]  ;;  %v641_v31 = vld [vmem:[%s914_s5 + $0x38] sm:$0xff] }
  0x15   :  { %284 = vmatpush.bf16.msra.mxu3 %v632_v17  ;;  %v626_v30 = vld [vmem:[%s912_s3 + $0x40] sm:$0xff]  ;;  %v640_v32 = vld [vmem:[%s914_s5 + $0x30] sm:$0xff]  ;;  %v639_v33 = vld [vmem:[%s914_s5 + $0x28] sm:$0xff] }
  0x16   :  { %499 = vmatmul.msk.bf16.vlgmr.msra.gmra.mxu0 %vm99_vm0, %v68_v18  ;;  %v638_v34 = vld [vmem:[%s914_s5 + $0x20] sm:$0xff]  ;;  %v637_v52 = vld [vmem:[%s914_s5 + $0x18] sm:$0xff]  ;;  %v636_v53 = vld [vmem:[%s914_s5 + $0x10] sm:$0xff] }
  0x17   :  { %500 = vmatmul.msk.bf16.vlgmr.msra.gmra.mxu1 %vm99_vm0, %v68_v18  ;;  %368 = vmatpush.bf16.msrb.mxu0 %v641_v31  ;;  %v73_v35 = vld [vmem:[%s911_s2] sm:$0x3]  ;;  %v635_v54 = vld [vmem:[%s914_s5 + $0x8] sm:$0xff]  ;;  %v645_v56 = vld [vmem:[#allocation5 + $0x18] sm:$0xff] }
  0x18   :  { %271 = vmatpush.bf16.msra.mxu2 %v623_v19  ;;  %v75_v38 = vperm.slane %v73_v35, 0  ;;  %v76_v39 = vperm.slane %v73_v35, 1  ;;  %v634_v55 = vld [vmem:[%s914_s5] sm:$0xff]  ;;  %429 = vmatpush.bf16.msrb.mxu1 %v645_v56  ;;  %v644_v5 = vld [vmem:[#allocation5 + $0x10] sm:$0xff]  ;;  %v643_v6 = vld [vmem:[#allocation5 + $0x8] sm:$0xff] }
  0x19   :  { %285 = vmatpush.bf16.msra.mxu3 %v631_v20  ;;  %v658_v58 = vld [vmem:[%s913_s4] ss:$0 sm:$0xff] }
  0x1a   :  { %v642_v7 = vld [vmem:[#allocation5] sm:$0xff] }
  0x1b   :  { %369 = vmatpush.bf16.msrb.mxu0 %v640_v32  ;;  %v659_v9 = vld [vmem:[%s915_s6] ss:$0 sm:$0xff]  ;;  %s753_s6 = smov [#allocation7]  }
  0x1c   :  { %272 = vmatpush.bf16.msra.mxu2 %v622_v21  ;;  %430 = vmatpush.bf16.msrb.mxu1 %v644_v5  ;;  %v660_v16 = vld [vmem:[%s917_s8] ss:$0 sm:$0xff]  ;;  %s467_s8 = sshll.u32 %s753_s6, 4  ;;  %s468_s8 = int_to_ptr.vmem [resolvable:$true] %s467_s8 }
  0x1d   :  { %286 = vmatpush.bf16.msra.mxu3 %v630_v22 }
  0x1f   :  { %370 = vmatpush.bf16.msrb.mxu0 %v639_v33 }
  0x20   :  { %273 = vmatpush.bf16.msra.mxu2 %v621_v23  ;;  %431 = vmatpush.bf16.msrb.mxu1 %v643_v6 }
  0x21   :  { %287 = vmatpush.bf16.msra.mxu3 %v629_v24 }
  0x23   :  { %371 = vmatpush.bf16.msrb.mxu0 %v638_v34 }
  0x24   :  { %274 = vmatpush.bf16.msra.mxu2 %v620_v25  ;;  %432 = vmatpush.bf16.msrb.mxu1 %v642_v7 }
  0x25   :  { %288 = vmatpush.bf16.msra.mxu3 %v628_v26 }
  0x27   :  { %372 = vmatpush.bf16.msrb.mxu0 %v637_v52 }
  0x28   :  { %275 = vmatpush.bf16.msra.mxu2 %v619_v27 }
  0x29   :  { %289 = vmatpush.bf16.msra.mxu3 %v627_v28 }
  0x2b   :  { %373 = vmatpush.bf16.msrb.mxu0 %v636_v53 }
  0x2c   :  { %276 = vmatpush.bf16.msra.mxu2 %v618_v29 }
  0x2d   :  { %290 = vmatpush.bf16.msra.mxu3 %v626_v30 }
  0x2f   :  { %374 = vmatpush.bf16.msrb.mxu0 %v635_v54 }
  0x33   :  { %375 = vmatpush.bf16.msrb.mxu0 %v634_v55 }
  0x93   :  { %v112_v36 = vpop.f32.mrf.mxu0 }
  0x94   :  { %v126_v37 = vpop.f32.mrf.mxu1  ;;  %v113_v40 = vadd.f32 %v112_v36, %v75_v38 }
  0x95   :  { %v127_v41 = vadd.f32 %v126_v37, %v76_v39 }
  0x96   :  { %v131_v46 = vmax.f32 %v113_v40, 0.0 }
  0x97   :  { %v132_v48 = vmax.f32 %v127_v41, 0.0 }
  0x9b   :  { %v114_v42 = vpop.f32.mrf.mxu0 }
  0x9c   :  { %v115_v43 = vadd.f32 %v114_v42, %v75_v38  ;;  %v128_v44 = vpop.f32.mrf.mxu1 }
  0x9d   :  { %v129_v45 = vadd.f32 %v128_v44, %v76_v39 }
  0x9e   :  { %v133_v47 = vmax.f32 %v115_v43, 0.0 }
  0x9f   :  { %v134_v49 = vmax.f32 %v129_v45, 0.0 }
  0xa0   :  { %v135_v50 = vpack.c.bf16 %v133_v47, %v131_v46 }
  0xa1   :  { %v136_v51 = vpack.c.bf16 %v134_v49, %v132_v48 }
  0xa2   :  { %277 = vmatmul.bf16.vlgmr.msra.gmra.mxu2 %v135_v50 }
  0xa3   :  { %291 = vmatmul.bf16.vlgmr.msra.gmra.mxu3 %v136_v51 }
 0x125   :  { %v278_v57 = vpop.f32.mrf.mxu2 }
 0x126   :  { %v292_v59 = vpop.f32.mrf.mxu3  ;;  %v279_v60 = vadd.f32 %v658_v58, %v278_v57 }
 0x128   :  { %v293_v62 = vadd.f32 %v292_v59, %v279_v60 }
 0x12a   :  { %v297_v2 = vmax.f32 %v293_v62, 0.0 }
 0x12d   :  { %v280_v61 = vpop.f32.mrf.mxu2 }
 0x12e   :  { %v281_v63 = vadd.f32 %v658_v58, %v280_v61  ;;  %v294_v0 = vpop.f32.mrf.mxu3 }
 0x130   :  { %v295_v1 = vadd.f32 %v294_v0, %v281_v63 }
 0x132   :  { %v298_v3 = vmax.f32 %v295_v1, 0.0 }
 0x134   :  { %v299_v4 = vpack.c.bf16 %v298_v3, %v297_v2 }
 0x136   :  { %376 = vmatmul.bf16.vlgmr.msrb.gmra.mxu0 %v299_v4 }
 0x1b3   :  { %v377_v8 = vpop.f32.mrf.mxu0 }
 0x1b4   :  { %v378_v10 = vadd.f32 %v659_v9, %v377_v8 }
 0x1b6   :  { %v382_v13 = vmax.f32 %v378_v10, 0.0 }
 0x1bb   :  { %v379_v11 = vpop.f32.mrf.mxu0 }
 0x1bc   :  { %v380_v12 = vadd.f32 %v659_v9, %v379_v11 }
 0x1be   :  { %v383_v14 = vmax.f32 %v380_v12, 0.0 }
 0x1c0   :  { %v384_v15 = vpack.c.bf16 %v383_v14, %v382_v13 }
 0x1c2   :  { %613 = vmatmul.msk.bf16.vlgmr.msrb.gmra.mxu1 %vm421_vm1, %v384_v15 }
 0x23f   :  { %v434_v17 = vpop.f32.mrf.mxu1 }
 0x240   :  { %v435_v18 = vadd.f32 %v660_v16, %v434_v17 }
 0x242   :  { %439 = vmax.xlane.f32.xlu0 %v435_v18 }
 0x247   :  { %v436_v19 = vpop.f32.mrf.mxu1 }
 0x248   :  { %v437_v20 = vadd.f32 %v660_v16, %v436_v19 }
 0x24a   :  { %441 = vmax.xlane.f32.xlu0 %v437_v20 }
 0x2b5   :  { %v440_v21 = vpop.xlane.xlu0 %439 }
 0x2b6   :  { %v443_v22 = vsub.f32 %v435_v18, %v440_v21 }
 0x2b8   :  { %v445_v23 = vmul.f32 1.442695, %v443_v22 }
 0x2ba   :  { %661 = vpow2.f32 %v445_v23 }
 0x2bd   :  { %v442_v24 = vpop.xlane.xlu0 %441 }
 0x2be   :  { %v444_v25 = vsub.f32 %v437_v20, %v442_v24 }
 0x2c0   :  { %v662_v26 = vpop.eup %661  ;;  %v447_v27 = vmul.f32 1.442695, %v444_v25 }
 0x2c1   :  { %449 = vadd.xlane.f32.xlu1 %v662_v26 }
 0x2c2   :  { %663 = vpow2.f32 %v447_v27 }
 0x2c8   :  { %v664_v28 = vpop.eup %663 }
 0x2c9   :  { %451 = vadd.xlane.f32.xlu1 %v664_v28 }
 0x334   :  { %v450_v29 = vpop.xlane.xlu1 %449 }
 0x335   :  { %665 = vlog2.f32 %v450_v29 }
 0x33b   :  { %v666_v31 = vpop.eup %665 }
 0x33c   :  { %v452_v30 = vpop.xlane.xlu1 %451  ;;  %v454_v32 = vmul.f32 0.6931472, %v666_v31 }
 0x33d   :  { %667 = vlog2.f32 %v452_v30 }
 0x33e   :  { %v457_v35 = vsub.f32 %v443_v22, %v454_v32 }
 0x343   :  { %v668_v33 = vpop.eup %667 }
 0x344   :  { %v456_v34 = vmul.f32 0.6931472, %v668_v33 }
 0x346   :  { %v458_v36 = vsub.f32 %v444_v25, %v456_v34 }
 0x348   :  { %v649_v37 = vpack.c.bf16 %v458_v36, %v457_v35 }
 0x34a   :  { %650 = vst [vmem:[#allocation7] sm:$0xff] %v649_v37  }
 0x34b   :  { %475 = dma.vmem_to_hbm [thread:$0]  %s468_s8, 128, %s470_s13, [#allocation4], %s751_s21, %s751_s21, %s752_s22  }
 0x34c   :  { %745 = dma.done.wait [#allocation4], 128  }
 0x34d   :  { %746 = vsyncadd [#allocation4], 4294967168 }
 0x34e   :  { %480 = vsyncpa [#allocation3], 1 }
 0x34f   :  { %481 = vsyncpa [#allocation6], 1 }
 0x350   :  { %482 = vsyncpa [#allocation4], 1 }

</bundles_post_ra>
